<compile_context>
chip_gen: v5e
topology: v5e:2x2
jax: 0.10.0
libtpu: 0.0.40
codegen_flags: <defaults>
</compile_context>

<pallas_src>
import jax
import jax.numpy as jnp
from jax.experimental import pallas as pl
from jax.experimental.pallas import tpu as pltpu


def linmodel_kernel(x_ref, wenc_ref, benc_ref, wlin_ref, blin_ref, out_ref):
    # x_ref:    [TB, C, H*W]  bf16   (one batch tile)
    # wenc_ref: [C, F]        bf16   (encoder projection, pre-scaled by 1/(H*W))
    # benc_ref: [1, F]        f32
    # wlin_ref: [F, Npad]     bf16   (nn.Linear weight, transposed + lane-padded)
    # blin_ref: [1, Npad]     f32
    # out_ref:  [TB, Npad]    f32
    #
    # Upcast before the reduction: elementwise/VPU math stays in f32
    # (v5e's VPU has no bf16), bf16 is only used for HBM traffic + MXU inputs.
    x = x_ref[...].astype(jnp.float32)
    pooled = jnp.sum(x, axis=-1)                      # [TB, C] GAP (scale folded into wenc)
    feat = jnp.dot(pooled.astype(jnp.bfloat16), wenc_ref[...],
                   preferred_element_type=jnp.float32) + benc_ref[...]
    feat = jnp.maximum(feat, 0.0)                     # encoder features (ReLU)
    logits = jnp.dot(feat.astype(jnp.bfloat16), wlin_ref[...],
                     preferred_element_type=jnp.float32) + blin_ref[...]
    out_ref[...] = logits                             # self.lin(self.enc(x))


def _choose_batch_tile(B, C, HW, itemsize=2, x_pair_budget_bytes=16 << 20):
    """Largest batch tile whose double-buffered bf16 x slab fits the budget.

    Budget is sized conservatively for v7x (64 MiB physical / 32 MiB scoped
    VMEM per TensorCore); on v5e/v6e (128 MiB) it simply leaves headroom.
    """
    per_row = C * HW * itemsize
    tb = max(1, x_pair_budget_bytes // (2 * per_row))
    if tb >= B:
        return int(B)                 # single-tile batch (small-B demo case)
    return int(max(8, (tb // 8) * 8))  # sublane-aligned tiles otherwise


def lin_model_forward(x_nchw, w_enc, b_enc, w_lin, b_lin,
                      *, vmem_limit_bytes=48 * 1024 * 1024):
    """x_nchw: [B, C, H, W] float32. Returns logits [B, n_classes] float32."""
    B, C, H, W = x_nchw.shape
    HW = H * W
    F = w_enc.shape[1]
    N = w_lin.shape[0]                # PyTorch nn.Linear weight: [n_classes, feature_dim]

    # ---- host-side (tiny, one-time) parameter prep --------------------------
    LANES = 128
    N_pad = ((N + LANES - 1) // LANES) * LANES        # lane-dense output width
    w_enc_b = (w_enc / float(HW)).astype(jnp.bfloat16)                    # fold GAP scale
    b_enc2 = b_enc.reshape(1, F).astype(jnp.float32)
    w_lin_t = (jnp.zeros((F, N_pad), jnp.float32)
               .at[:, :N].set(w_lin.T).astype(jnp.bfloat16))
    b_lin2 = jnp.zeros((1, N_pad), jnp.float32).at[:, :N].set(b_lin.reshape(1, N))

    # ---- batch tiling --------------------------------------------------------
    x_flat = x_nchw.reshape(B, C, HW).astype(jnp.bfloat16)
    TB = _choose_batch_tile(B, C, HW)
    num_tiles = pl.cdiv(B, TB)
    B_pad = num_tiles * TB
    if B_pad != B:
        x_flat = jnp.pad(x_flat, ((0, B_pad - B), (0, 0), (0, 0)))

    flops = int(2 * B_pad * C * F + 2 * B_pad * F * N_pad + B_pad * C * HW)
    bytes_accessed = int(B_pad * C * HW * 2            # bf16 x (dominant term)
                         + C * F * 2 + F * N_pad * 2   # bf16 weights
                         + (F + N_pad) * 4             # f32 biases
                         + B_pad * N_pad * 4)          # f32 logits out

    logits_pad = pl.pallas_call(
        linmodel_kernel,
        out_shape=jax.ShapeDtypeStruct((B_pad, N_pad), jnp.float32),
        grid=(num_tiles,),
        in_specs=[
            pl.BlockSpec((TB, C, HW), lambda i: (i, 0, 0)),   # streamed batch tiles
            pl.BlockSpec((C, F), lambda i: (0, 0)),           # weights: constant index_map
            pl.BlockSpec((1, F), lambda i: (0, 0)),           #  -> stay VMEM-resident
            pl.BlockSpec((F, N_pad), lambda i: (0, 0)),
            pl.BlockSpec((1, N_pad), lambda i: (0, 0)),
        ],
        out_specs=pl.BlockSpec((TB, N_pad), lambda i: (i, 0)),
        compiler_params=pltpu.CompilerParams(
            dimension_semantics=("parallel",),                # v7x: shard batch over 2 TCs
            vmem_limit_bytes=vmem_limit_bytes,
        ),
        cost_estimate=pl.CostEstimate(
            flops=flops, transcendentals=0, bytes_accessed=bytes_accessed),
    )(x_flat, w_enc_b, b_enc2, w_lin_t, b_lin2)

    return logits_pad[:B, :N]


if __name__ == "__main__":
    # Small shapes consistent with the module's forward.
    B, C, H, W = 2, 4, 16, 16
    feature_dim, n_classes = 32, 10

    key = jax.random.PRNGKey(0)
    kx, ke, kbe, kl, kbl = jax.random.split(key, 5)

    x = jax.random.normal(kx, (B, C, H, W), dtype=jnp.float32)
    # Deterministic synthetic parameters (no checkpoint load).
    w_enc = jax.random.normal(ke, (C, feature_dim), dtype=jnp.float32) * 0.1
    b_enc = jax.random.normal(kbe, (feature_dim,), dtype=jnp.float32) * 0.01
    w_lin = jax.random.normal(kl, (n_classes, feature_dim), dtype=jnp.float32) * 0.1
    b_lin = jax.random.normal(kbl, (n_classes,), dtype=jnp.float32) * 0.01

    out = lin_model_forward(x, w_enc, b_enc, w_lin, b_lin)
    out = jax.block_until_ready(out)
    assert out.shape == (B, n_classes)

    # Reference 1: exact mirror of the kernel's bf16-DMA / f32-accumulate path.
    xb = x.reshape(B, C, H * W).astype(jnp.bfloat16).astype(jnp.float32)
    pooled = jnp.sum(xb, axis=-1)
    wenc_b = (w_enc / float(H * W)).astype(jnp.bfloat16)
    feat = jnp.maximum(
        jnp.dot(pooled.astype(jnp.bfloat16), wenc_b,
                preferred_element_type=jnp.float32) + b_enc, 0.0)
    ref_mixed = jnp.dot(feat.astype(jnp.bfloat16), w_lin.T.astype(jnp.bfloat16),
                        preferred_element_type=jnp.float32) + b_lin
    assert jnp.allclose(out, ref_mixed, atol=1e-3, rtol=1e-3)

    # Reference 2: original full-f32 module semantics (loose tol for bf16 cast).
    pooled_f32 = jnp.mean(x.reshape(B, C, H * W), axis=-1)
    feat_f32 = jnp.maximum(pooled_f32 @ w_enc + b_enc, 0.0)
    ref_f32 = feat_f32 @ w_lin.T + b_lin
    assert jnp.allclose(out, ref_f32, atol=5e-2, rtol=5e-2)

    print("KERNEL_OK")
</pallas_src>

<mosaic_0001>
module attributes {stable_mosaic.version = 11 : i64} {
  func.func @linmodel_kernel(%arg0: i32, %arg1: memref<2x4x256xbf16, #tpu.memory_space<vmem>>, %arg2: memref<4x32xbf16, #tpu.memory_space<vmem>>, %arg3: memref<1x32xf32, #tpu.memory_space<vmem>>, %arg4: memref<32x128xbf16, #tpu.memory_space<vmem>>, %arg5: memref<1x128xf32, #tpu.memory_space<vmem>>, %arg6: memref<2x128xf32, #tpu.memory_space<vmem>>) attributes {dimension_semantics = [#tpu.dimension_semantics<parallel>], iteration_bounds = array<i64: 1>, scalar_prefetch = 0 : i64, scratch_operands = 0 : i64, tpu.core_type = #tpu.core_type<tc>, window_params = [{transform_indices = @transform_0, window_bounds = array<i64: 2, 4, 256>}, {pipeline_mode = #tpu.pipeline_mode<synchronous>, transform_indices = @transform_1, window_bounds = array<i64: 4, 32>}, {pipeline_mode = #tpu.pipeline_mode<synchronous>, transform_indices = @transform_2, window_bounds = array<i64: 1, 32>}, {pipeline_mode = #tpu.pipeline_mode<synchronous>, transform_indices = @transform_3, window_bounds = array<i64: 32, 128>}, {pipeline_mode = #tpu.pipeline_mode<synchronous>, transform_indices = @transform_4, window_bounds = array<i64: 1, 128>}, {transform_indices = @transform_5, window_bounds = array<i64: 2, 128>}]} {
    %c0 = arith.constant 0 : index
    %c0_0 = arith.constant 0 : index
    %c0_1 = arith.constant 0 : index
    %0 = vector.load %arg1[%c0, %c0_0, %c0_1] : memref<2x4x256xbf16, #tpu.memory_space<vmem>>, vector<2x4x256xbf16>
    %1 = arith.extf %0 : vector<2x4x256xbf16> to vector<2x4x256xf32>
    %cst = arith.constant dense<0.000000e+00> : vector<2x4xf32>
    %2 = vector.multi_reduction <add>, %1, %cst [2] : vector<2x4x256xf32> to vector<2x4xf32>
    %3 = arith.truncf %2 : vector<2x4xf32> to vector<2x4xbf16>
    %c0_2 = arith.constant 0 : index
    %c0_3 = arith.constant 0 : index
    %4 = vector.load %arg2[%c0_2, %c0_3] : memref<4x32xbf16, #tpu.memory_space<vmem>>, vector<4x32xbf16>
    %cst_4 = arith.constant dense<0.000000e+00> : vector<2x32xf32>
    %5 = tpu.matmul %3, %4, %cst_4 {dimension_numbers = #tpu.dot_dimension_numbers<[1], [0], [0], [1], [0, 0, 1, 1], [], []>} : vector<2x4xbf16>, vector<4x32xbf16>, vector<2x32xf32> -> vector<2x32xf32>
    %c0_5 = arith.constant 0 : index
    %c0_6 = arith.constant 0 : index
    %6 = vector.load %arg3[%c0_5, %c0_6] : memref<1x32xf32, #tpu.memory_space<vmem>>, vector<1x32xf32>
    %7 = vector.broadcast %6 : vector<1x32xf32> to vector<2x32xf32>
    %8 = arith.addf %5, %7 : vector<2x32xf32>
    %cst_7 = arith.constant 0.000000e+00 : f32
    %9 = vector.broadcast %cst_7 : f32 to vector<2x32xf32>
    %10 = arith.maximumf %8, %9 : vector<2x32xf32>
    %11 = arith.truncf %10 : vector<2x32xf32> to vector<2x32xbf16>
    %c0_8 = arith.constant 0 : index
    %c0_9 = arith.constant 0 : index
    %12 = vector.load %arg4[%c0_8, %c0_9] : memref<32x128xbf16, #tpu.memory_space<vmem>>, vector<32x128xbf16>
    %cst_10 = arith.constant dense<0.000000e+00> : vector<2x128xf32>
    %13 = tpu.matmul %11, %12, %cst_10 {dimension_numbers = #tpu.dot_dimension_numbers<[1], [0], [0], [1], [0, 0, 1, 1], [], []>} : vector<2x32xbf16>, vector<32x128xbf16>, vector<2x128xf32> -> vector<2x128xf32>
    %c0_11 = arith.constant 0 : index
    %c0_12 = arith.constant 0 : index
    %14 = vector.load %arg5[%c0_11, %c0_12] : memref<1x128xf32, #tpu.memory_space<vmem>>, vector<1x128xf32>
    %15 = vector.broadcast %14 : vector<1x128xf32> to vector<2x128xf32>
    %16 = arith.addf %13, %15 : vector<2x128xf32>
    %c0_13 = arith.constant 0 : index
    %c0_14 = arith.constant 0 : index
    %17 = vector.load %arg6[%c0_13, %c0_14] : memref<2x128xf32, #tpu.memory_space<vmem>>, vector<2x128xf32>
    tpu.vector_store %arg6[%c0_13, %c0_14], %16 {strides = array<i32>} : memref<2x128xf32, #tpu.memory_space<vmem>>, vector<2x128xf32>,
    return
  }
  func.func @transform_0(%arg0: i32) -> (i32, i32, i32) {
    %c0_i32 = arith.constant 0 : i32
    %c0_i32_0 = arith.constant 0 : i32
    %c0_i32_1 = arith.constant 0 : i32
    return %arg0, %c0_i32, %c0_i32_0 : i32, i32, i32
  }
  func.func @transform_1(%arg0: i32) -> (i32, i32) {
    %c0_i32 = arith.constant 0 : i32
    %c0_i32_0 = arith.constant 0 : i32
    %c0_i32_1 = arith.constant 0 : i32
    return %c0_i32, %c0_i32_0 : i32, i32
  }
  func.func @transform_2(%arg0: i32) -> (i32, i32) {
    %c0_i32 = arith.constant 0 : i32
    %c0_i32_0 = arith.constant 0 : i32
    %c0_i32_1 = arith.constant 0 : i32
    return %c0_i32, %c0_i32_0 : i32, i32
  }
  func.func @transform_3(%arg0: i32) -> (i32, i32) {
    %c0_i32 = arith.constant 0 : i32
    %c0_i32_0 = arith.constant 0 : i32
    %c0_i32_1 = arith.constant 0 : i32
    return %c0_i32, %c0_i32_0 : i32, i32
  }
  func.func @transform_4(%arg0: i32) -> (i32, i32) {
    %c0_i32 = arith.constant 0 : i32
    %c0_i32_0 = arith.constant 0 : i32
    %c0_i32_1 = arith.constant 0 : i32
    return %c0_i32, %c0_i32_0 : i32, i32
  }
  func.func @transform_5(%arg0: i32) -> (i32, i32) {
    %c0_i32 = arith.constant 0 : i32
    %c0_i32_0 = arith.constant 0 : i32
    return %arg0, %c0_i32 : i32, i32
  }
}

</mosaic_0001>

<bundles_post_ra>
// kernel: tpu_custom_call.1
= control target key start
LH: loop header
LB: loop body
LE: loop exit
PB: predicated region body
PF: predicated region fallthrough
CT: control target
= control target key end

     0   :  { %10 = vsyncpa [#allocation3], 0  ;;  %s372_s0 = inlined_call_operand.hbm [shape: bf16[2,4,256], index: 0, kind: input, shape index: {}]   ;;  %s373_s1 = inlined_call_operand.hbm [shape: bf16[4,32], index: 1, kind: input, shape index: {}]   ;;  %s374_s2 = inlined_call_operand.vmem [shape: f32[1,32], index: 2, kind: input, shape index: {}]   ;;  %s375_s3 = inlined_call_operand.hbm [shape: bf16[32,128], index: 3, kind: input, shape index: {}]   ;;  %s376_s4 = inlined_call_operand.vmem [shape: f32[1,128], index: 4, kind: input, shape index: {}]   ;;  %s377_s5 = inlined_call_operand.hbm [shape: f32[2,128], index: 5, kind: output, shape index: {}]  }
   0x1   :  { %11 = vsyncpa [#allocation6], 0  ;;  %s31_s20 = sshll.u32 %s373_s1, 4  ;;  %s32_s20 = int_to_ptr.hbm [resolvable:$true] %s31_s20 }
   0x2   :  { %12 = vsyncpa [#allocation4], 0  ;;  %s318_s21 = smov [#allocation5]   ;;  %s17_s25 = sshll.u32 %s372_s0, 4  ;;  %s18_s25 = int_to_ptr.hbm [resolvable:$true] %s17_s25 }
   0x3   :  { %s33_s22 = sshll.u32 %s318_s21, 4  ;;  %s319_s26 = smov [#allocation2]   ;;  %s34_s22 = int_to_ptr.vmem [resolvable:$true] %s33_s22 }
   0x4   :  { %36 = dma.hbm_to_vmem [thread:$0]  %s32_s20, 32, %s34_s22, [#allocation6]  }
   0x5   :  { %s19_s27 = sshll.u32 %s319_s26, 4  ;;  %s320_s28 = smov 64   ;;  %s20_s27 = int_to_ptr.vmem [resolvable:$true] %s19_s27 }
   0x6   :  { %s321_s29 = smov 4   ;;  %s43_s1 = sshll.u32 %s375_s3, 4  ;;  %s44_s1 = int_to_ptr.hbm [resolvable:$true] %s43_s1 }
   0x7   :  { %25 = dma.hbm_to_vmem [thread:$0]  %s18_s25, 128, %s20_s27, [#allocation3], %s320_s28, %s320_s28, %s321_s29  }
   0x8   :  { %s322_s7 = smov [#allocation7]  }
   0x9   :  { %s45_s8 = sshll.u32 %s322_s7, 4  ;;  %s46_s8 = int_to_ptr.vmem [resolvable:$true] %s45_s8 }
   0xa   :  { %51 = dma.hbm_to_vmem [thread:$0]  %s44_s1, 256, %s46_s8, [#allocation6], %s320_s28, %s320_s28, %s321_s29  }
   0xb   :  { %312 = dma.done.wait [#allocation3], 128  }
   0xc   :  { %313 = vsyncadd [#allocation3], 4294967168 }
   0xd   :  { %314 = dma.done.wait [#allocation6], 288  }
   0xe   :  { %315 = vsyncadd [#allocation6], 4294967008  ;;  %v205_v0 = vld [vmem:[#allocation2] sm:$0xff]   ;;  %vm84_vm0 = vcmask 1043456   ;;  %v97_v13 = vld [vmem:[#allocation5] sm:$0x3]  ;;  %v106_v16 = vlaneseq }
   0xf   :  { %v206_v1 = vunpack.c.l.bf16 %v205_v0  ;;  %v207_v2 = vunpack.c.h.bf16 %v205_v0  ;;  %vm117_vm1 = vcmask 1041408   ;;  %vm110_vm2 = vcmask 1041409   ;;  %v203_v27 = vld [vmem:[#allocation7 + $0x8] sm:$0xff]  ;;  %v202_v28 = vld [vmem:[#allocation7] sm:$0xff]  ;;  %s323_s11 = smov [#allocation8]   ;;  %s181_s15 = sshll.u32 %s377_s5, 4  ;;  %s182_s15 = int_to_ptr.hbm [resolvable:$true] %s181_s15 }
  0x10   :  { %v119_v14 = vsel %vm117_vm1, %v97_v13, 0  ;;  %v107_v19 = vand.u32 127, %v106_v16  ;;  %vm113_vm3 = vcmask 31744   ;;  %166 = vmatpush.bf16.msra.mxu1 %v203_v27  ;;  %v214_v29 = vld [vmem:[%s374_s2] ss:$0 sm:$0xff]  ;;  %vm156_vm4 = vcmask 261120  }
  0x11   :  { %73 = vst [vmem:[#allocation1] ss:$2 sm:$0xff] %v206_v1  ;;  %128 = vmatpush.bf16.msra.mxu0 %v119_v14  ;;  %v215_v35 = vld [vmem:[%s376_s4] ss:$0 sm:$0xff]  ;;  %s179_s12 = sshll.u32 %s323_s11, 4  ;;  %s180_s12 = int_to_ptr.vmem [resolvable:$true] %s179_s12 }
  0x12   :  { %77 = vst [vmem:[#allocation1 + $0x10] ss:$2 sm:$0xff] %v207_v2 }
  0x14   :  { %167 = vmatpush.bf16.msra.mxu1 %v202_v28 }
  0x18   :  { %v74_v3 = vld.sshfl [vmem:[#allocation1] sm:$0xff pattern:$0x75316420]  ;;  %v75_v4 = vld.sshfl [vmem:[#allocation1 + $0x8] sm:$0xff pattern:$0x75316420] }
  0x19   :  { %v85_v5 = vsel %vm84_vm0, %v74_v3, 0.0  ;;  %v86_v6 = vsel %vm84_vm0, %v75_v4, 0.0  ;;  %v78_v8 = vld.sshfl [vmem:[#allocation1 + $0x10] sm:$0xff pattern:$0x75316420] }
  0x1a   :  { %v87_v7 = vadd.f32 %v86_v6, %v85_v5  ;;  %v79_v9 = vld.sshfl [vmem:[#allocation1 + $0x18] sm:$0xff pattern:$0x75316420]  ;;  %v90_v10 = vsel %vm84_vm0, %v78_v8, 0.0 }
  0x1b   :  { %v91_v11 = vsel %vm84_vm0, %v79_v9, 0.0 }
  0x1c   :  { %88 = vadd.xlane.f32.xlu0 %v87_v7  ;;  %v92_v12 = vadd.f32 %v91_v11, %v90_v10 }
  0x24   :  { %93 = vadd.xlane.f32.xlu0 %v92_v12 }
  0x8f   :  { %v89_v15 = vpop.xlane.xlu0 %88 }
  0x90   :  { %v95_v17 = vpack.c.bf16 %v89_v15, %v89_v15 }
  0x92   :  { %v104_v20 = vunpack.c.l.b16 %v95_v17 }
  0x94   :  { %v108_v23 = vperm.slane %v104_v20, %v107_v19 }
  0x97   :  { %v94_v18 = vpop.xlane.xlu0 %93 }
  0x98   :  { %v96_v21 = vpack.c.bf16 %v94_v18, %v94_v18 }
  0x9a   :  { %v105_v22 = vunpack.c.l.b16 %v96_v21 }
  0x9c   :  { %v109_v24 = vperm.slane %v105_v22, %v107_v19 }
  0x9e   :  { %v111_v25 = vsel %vm110_vm2, %v109_v24, %v108_v23 }
  0x9f   :  { %v112_v26 = vpack.c.b16 %v111_v25, %v111_v25 }
  0xa1   :  { %192 = vmatmul.msk.bf16.vlgmr.msra.gmra.mxu0 %vm113_vm3, %v112_v26 }
 0x11e   :  { %v130_v30 = vpop.f32.mrf.mxu0 }
 0x11f   :  { %v131_v31 = vadd.f32 %v214_v29, %v130_v30 }
 0x121   :  { %v134_v32 = vmax.f32 %v131_v31, 0.0 }
 0x123   :  { %v135_v33 = vpack.c.bf16 %v134_v32, %v134_v32 }
 0x125   :  { %201 = vmatmul.msk.bf16.vlgmr.msra.gmra.mxu1 %vm156_vm4, %v135_v33 }
 0x126   :  { %v132_v34 = vpop.f32.mrf.mxu0 }
 0x1a2   :  { %v169_v36 = vpop.f32.mrf.mxu1 }
 0x1a3   :  { %v170_v37 = vadd.f32 %v215_v35, %v169_v36 }
 0x1a5   :  { %173 = vst [vmem:[#allocation8] sm:$0x3] %v170_v37 }
 0x1a6   :  { %184 = dma.vmem_to_hbm [thread:$0]  %s180_s12, 32, %s182_s15, [#allocation4]  }
 0x1aa   :  { %v171_v38 = vpop.f32.mrf.mxu1 }
 0x1ab   :  { %316 = dma.done.wait [#allocation4], 32  }
 0x1ac   :  { %317 = vsyncadd [#allocation4], 4294967264 }
 0x1ad   :  { %189 = vsyncpa [#allocation3], 1 }
 0x1ae   :  { %190 = vsyncpa [#allocation6], 1 }
 0x1af   :  { %191 = vsyncpa [#allocation4], 1 }

</bundles_post_ra>
